<compile_context>
chip_gen: v7x
topology: tpu7x:2x2x1
jax: 0.10.0
libtpu: 0.0.40
codegen_flags: <defaults>
</compile_context>

<pallas_src>
import jax
import jax.numpy as jnp
import numpy as np
from jax.experimental import pallas as pl
from jax.experimental.pallas import tpu as pltpu

THRESH = 1.0


def clrnet_kernel(x_ref, noise_ref,
                  w1_ref, b1_ref, w2_ref, b2_ref,
                  wd0_ref, bd0_ref, wd1_ref, bd1_ref,
                  out_ref, spikes_ref, mem_ref):
    """One batch tile of the CLRNET forward (refractory == 0 path).

    Weights are pre-transposed [in, out] and pre-cast to bf16; activations are
    cast to bf16 only at each MXU input, all element-wise math stays f32.
    """
    bf16 = jnp.bfloat16
    x = x_ref[...]

    # ---- encoder: Linear -> ReLU -> Linear -> Sigmoid ----
    h = jnp.dot(x.astype(bf16), w1_ref[...],
                preferred_element_type=jnp.float32) + b1_ref[...]
    h = jnp.maximum(h, 0.0)
    enc = jnp.dot(h.astype(bf16), w2_ref[...],
                  preferred_element_type=jnp.float32) + b2_ref[...]
    enc = jax.nn.sigmoid(enc)
    mem_ref[...] = enc                       # pre-noise activation

    # ---- Bernoulli-like sampling: spike = (enc + U[0,1) > thresh) ----
    spikes = ((enc + noise_ref[...]) > THRESH).astype(jnp.float32)
    spikes_ref[...] = spikes

    # ---- decoder: Linear -> ReLU -> Linear -> Sigmoid ----
    d = jnp.dot(spikes.astype(bf16), wd0_ref[...],
                preferred_element_type=jnp.float32) + bd0_ref[...]
    d = jnp.maximum(d, 0.0)
    out = jnp.dot(d.astype(bf16), wd1_ref[...],
                  preferred_element_type=jnp.float32) + bd1_ref[...]
    out_ref[...] = jax.nn.sigmoid(out)


def _pick_batch_tile(B, requested=None, max_tile=512):
    """Largest multiple-of-8 divisor of B (<= max_tile); fall back to a single tile."""
    if requested is not None:
        assert B % requested == 0, "batch_tile must divide B"
        assert requested % 8 == 0 or requested == B, \
            "batch_tile must be a multiple of 8 (or equal B)"
        return requested
    if B <= max_tile:
        return B                                    # one fat tile, zero extra grid steps
    for t in range(min(max_tile, B), 7, -8):
        if B % t == 0 and t % 8 == 0:
            return t
    return B                                        # full-dim block is always legal


def clrnet_forward(x, noise, params, *, batch_tile=None):
    """x: [B, input_size] f32, noise: [B, e_hid] f32 (U[0,1)).

    params: dict of pre-transposed [in, out] weights and [1, out] biases (f32).
    """
    B, input_size = x.shape
    e_hid = params["w2"].shape[1]
    tb = _pick_batch_tile(B, batch_tile)

    # Pre-cast the tiny, VMEM-resident weights to bf16 for the MXU; biases stay f32.
    wb = {k: (v.astype(jnp.bfloat16) if k.startswith("w") else v.astype(jnp.float32))
          for k, v in params.items()}

    def tile_spec(feat):
        return pl.BlockSpec((tb, feat), lambda i: (i, 0))

    def resident_spec(arr):
        # Whole array as a single block; constant index_map -> stays resident in VMEM.
        return pl.BlockSpec(arr.shape, lambda i: (0, 0))

    grid = (B // tb,)

    out_shapes = (
        jax.ShapeDtypeStruct((B, input_size), jnp.float32),  # out
        jax.ShapeDtypeStruct((B, e_hid), jnp.float32),       # spikes
        jax.ShapeDtypeStruct((B, e_hid), jnp.float32),       # mem
    )

    return pl.pallas_call(
        clrnet_kernel,
        out_shape=out_shapes,
        grid=grid,
        in_specs=[tile_spec(input_size), tile_spec(e_hid),
                  resident_spec(wb["w1"]), resident_spec(wb["b1"]),
                  resident_spec(wb["w2"]), resident_spec(wb["b2"]),
                  resident_spec(wb["wd0"]), resident_spec(wb["bd0"]),
                  resident_spec(wb["wd1"]), resident_spec(wb["bd1"])],
        out_specs=(tile_spec(input_size), tile_spec(e_hid), tile_spec(e_hid)),
        compiler_params=pltpu.CompilerParams(
            dimension_semantics=("parallel",)),
    )(x, noise,
      wb["w1"], wb["b1"], wb["w2"], wb["b2"],
      wb["wd0"], wb["bd0"], wb["wd1"], wb["bd1"])


def _init_linear(key, fan_in, fan_out):
    """PyTorch-style uniform(-1/sqrt(fan_in), 1/sqrt(fan_in)); weight stored [in, out]."""
    kw, kb = jax.random.split(key)
    bound = 1.0 / np.sqrt(fan_in)
    w = jax.random.uniform(kw, (fan_in, fan_out), jnp.float32, -bound, bound)
    b = jax.random.uniform(kb, (1, fan_out), jnp.float32, -bound, bound)
    return w, b


if __name__ == "__main__":
    # Shapes consistent with CLRNET(input_size=64, ([32, 16], [16, 32]))
    B = 32
    input_size = 64
    e_hidden = (32, 16)
    d_hidden = (16, 32)

    key = jax.random.PRNGKey(0)
    k_x, k_n, k1, k2, k3, k4 = jax.random.split(key, 6)

    x = jax.random.uniform(k_x, (B, input_size), jnp.float32)
    noise = jax.random.uniform(k_n, (B, e_hidden[-1]), jnp.float32)   # torch.rand equivalent

    w1, b1 = _init_linear(k1, input_size, e_hidden[0])      # eLinear0 + ReLU
    w2, b2 = _init_linear(k2, e_hidden[0], e_hidden[1])      # eLinear1 + Sigmoid
    wd0, bd0 = _init_linear(k3, d_hidden[0], d_hidden[1])    # dLinear0 + ReLU
    wd1, bd1 = _init_linear(k4, d_hidden[1], input_size)     # dLinear1 + Sigmoid

    params = dict(w1=w1, b1=b1, w2=w2, b2=b2,
                  wd0=wd0, bd0=bd0, wd1=wd1, bd1=bd1)

    out, spikes, mem = clrnet_forward(x, noise, params)
    jax.block_until_ready((out, spikes, mem))

    # ---- reference (mirrors the kernel's bf16-operand / f32-accumulate matmuls) ----
    bf16, f32 = jnp.bfloat16, jnp.float32

    def mm(a, w, b):
        return jnp.dot(a.astype(bf16), w.astype(bf16),
                       preferred_element_type=f32) + b

    enc_ref = jax.nn.sigmoid(mm(jnp.maximum(mm(x, w1, b1), 0.0), w2, b2))
    np.testing.assert_allclose(np.asarray(mem), np.asarray(enc_ref),
                               rtol=5e-3, atol=5e-3)

    # spikes are binary and exactly consistent with the kernel's own mem + noise
    sp = np.asarray(spikes)
    assert set(np.unique(sp)).issubset({0.0, 1.0})
    sp_ref = (np.asarray(mem) + np.asarray(noise) > THRESH).astype(np.float32)
    np.testing.assert_array_equal(sp, sp_ref)

    # decoder output checked against the kernel's own spikes
    d_ref = jnp.maximum(mm(spikes, wd0, bd0), 0.0)
    out_ref = jax.nn.sigmoid(mm(d_ref, wd1, bd1))
    np.testing.assert_allclose(np.asarray(out), np.asarray(out_ref),
                               rtol=5e-3, atol=5e-3)

    assert out.shape == (B, input_size)
    assert spikes.shape == (B, e_hidden[-1]) and mem.shape == (B, e_hidden[-1])

    print("KERNEL_OK")
</pallas_src>

<mosaic_0001>
module attributes {stable_mosaic.version = 11 : i64} {
  func.func @clrnet_kernel(%arg0: i32, %arg1: memref<32x64xf32, #tpu.memory_space<vmem>>, %arg2: memref<32x16xf32, #tpu.memory_space<vmem>>, %arg3: memref<64x32xbf16, #tpu.memory_space<vmem>>, %arg4: memref<1x32xf32, #tpu.memory_space<vmem>>, %arg5: memref<32x16xbf16, #tpu.memory_space<vmem>>, %arg6: memref<1x16xf32, #tpu.memory_space<vmem>>, %arg7: memref<16x32xbf16, #tpu.memory_space<vmem>>, %arg8: memref<1x32xf32, #tpu.memory_space<vmem>>, %arg9: memref<32x64xbf16, #tpu.memory_space<vmem>>, %arg10: memref<1x64xf32, #tpu.memory_space<vmem>>, %arg11: memref<32x64xf32, #tpu.memory_space<vmem>>, %arg12: memref<32x16xf32, #tpu.memory_space<vmem>>, %arg13: memref<32x16xf32, #tpu.memory_space<vmem>>) attributes {dimension_semantics = [#tpu.dimension_semantics<parallel>], iteration_bounds = array<i64: 1>, scalar_prefetch = 0 : i64, scratch_operands = 0 : i64, tpu.core_type = #tpu.core_type<tc>, window_params = [{transform_indices = @transform_0, window_bounds = array<i64: 32, 64>}, {transform_indices = @transform_1, window_bounds = array<i64: 32, 16>}, {pipeline_mode = #tpu.pipeline_mode<synchronous>, transform_indices = @transform_2, window_bounds = array<i64: 64, 32>}, {pipeline_mode = #tpu.pipeline_mode<synchronous>, transform_indices = @transform_3, window_bounds = array<i64: 1, 32>}, {pipeline_mode = #tpu.pipeline_mode<synchronous>, transform_indices = @transform_4, window_bounds = array<i64: 32, 16>}, {pipeline_mode = #tpu.pipeline_mode<synchronous>, transform_indices = @transform_5, window_bounds = array<i64: 1, 16>}, {pipeline_mode = #tpu.pipeline_mode<synchronous>, transform_indices = @transform_6, window_bounds = array<i64: 16, 32>}, {pipeline_mode = #tpu.pipeline_mode<synchronous>, transform_indices = @transform_7, window_bounds = array<i64: 1, 32>}, {pipeline_mode = #tpu.pipeline_mode<synchronous>, transform_indices = @transform_8, window_bounds = array<i64: 32, 64>}, {pipeline_mode = #tpu.pipeline_mode<synchronous>, transform_indices = @transform_9, window_bounds = array<i64: 1, 64>}, {transform_indices = @transform_10, window_bounds = array<i64: 32, 64>}, {transform_indices = @transform_11, window_bounds = array<i64: 32, 16>}, {transform_indices = @transform_12, window_bounds = array<i64: 32, 16>}]} {
    %c0 = arith.constant 0 : index
    %c0_0 = arith.constant 0 : index
    %0 = vector.load %arg1[%c0, %c0_0] : memref<32x64xf32, #tpu.memory_space<vmem>>, vector<32x64xf32>
    %1 = arith.truncf %0 : vector<32x64xf32> to vector<32x64xbf16>
    %c0_1 = arith.constant 0 : index
    %c0_2 = arith.constant 0 : index
    %2 = vector.load %arg3[%c0_1, %c0_2] : memref<64x32xbf16, #tpu.memory_space<vmem>>, vector<64x32xbf16>
    %cst = arith.constant dense<0.000000e+00> : vector<32x32xf32>
    %3 = tpu.matmul %1, %2, %cst {dimension_numbers = #tpu.dot_dimension_numbers<[1], [0], [0], [1], [0, 0, 1, 1], [], []>} : vector<32x64xbf16>, vector<64x32xbf16>, vector<32x32xf32> -> vector<32x32xf32>
    %c0_3 = arith.constant 0 : index
    %c0_4 = arith.constant 0 : index
    %4 = vector.load %arg4[%c0_3, %c0_4] : memref<1x32xf32, #tpu.memory_space<vmem>>, vector<1x32xf32>
    %5 = vector.broadcast %4 : vector<1x32xf32> to vector<32x32xf32>
    %6 = arith.addf %3, %5 : vector<32x32xf32>
    %cst_5 = arith.constant 0.000000e+00 : f32
    %7 = vector.broadcast %cst_5 : f32 to vector<32x32xf32>
    %8 = arith.maximumf %6, %7 : vector<32x32xf32>
    %9 = arith.truncf %8 : vector<32x32xf32> to vector<32x32xbf16>
    %c0_6 = arith.constant 0 : index
    %c0_7 = arith.constant 0 : index
    %10 = vector.load %arg5[%c0_6, %c0_7] : memref<32x16xbf16, #tpu.memory_space<vmem>>, vector<32x16xbf16>
    %cst_8 = arith.constant dense<0.000000e+00> : vector<32x16xf32>
    %11 = tpu.matmul %9, %10, %cst_8 {dimension_numbers = #tpu.dot_dimension_numbers<[1], [0], [0], [1], [0, 0, 1, 1], [], []>} : vector<32x32xbf16>, vector<32x16xbf16>, vector<32x16xf32> -> vector<32x16xf32>
    %c0_9 = arith.constant 0 : index
    %c0_10 = arith.constant 0 : index
    %12 = vector.load %arg6[%c0_9, %c0_10] : memref<1x16xf32, #tpu.memory_space<vmem>>, vector<1x16xf32>
    %13 = vector.broadcast %12 : vector<1x16xf32> to vector<32x16xf32>
    %14 = arith.addf %11, %13 : vector<32x16xf32>
    %15 = arith.negf %14 : vector<32x16xf32>
    %16 = math.exp %15 : vector<32x16xf32>
    %cst_11 = arith.constant 1.000000e+00 : f32
    %17 = vector.broadcast %cst_11 : f32 to vector<32x16xf32>
    %18 = arith.addf %17, %16 : vector<32x16xf32>
    %19 = arith.divf %17, %18 : vector<32x16xf32>
    %c0_12 = arith.constant 0 : index
    %c0_13 = arith.constant 0 : index
    %20 = vector.load %arg13[%c0_12, %c0_13] : memref<32x16xf32, #tpu.memory_space<vmem>>, vector<32x16xf32>
    tpu.vector_store %arg13[%c0_12, %c0_13], %19 {strides = array<i32>} : memref<32x16xf32, #tpu.memory_space<vmem>>, vector<32x16xf32>,
    %c0_14 = arith.constant 0 : index
    %c0_15 = arith.constant 0 : index
    %21 = vector.load %arg2[%c0_14, %c0_15] : memref<32x16xf32, #tpu.memory_space<vmem>>, vector<32x16xf32>
    %22 = arith.addf %19, %21 : vector<32x16xf32>
    %cst_16 = arith.constant 1.000000e+00 : f32
    %23 = vector.broadcast %cst_16 : f32 to vector<32x16xf32>
    %24 = arith.cmpf ogt, %22, %23 : vector<32x16xf32>
    %25 = arith.extui %24 : vector<32x16xi1> to vector<32x16xi32>
    %26 = arith.sitofp %25 : vector<32x16xi32> to vector<32x16xf32>
    %c0_17 = arith.constant 0 : index
    %c0_18 = arith.constant 0 : index
    %27 = vector.load %arg12[%c0_17, %c0_18] : memref<32x16xf32, #tpu.memory_space<vmem>>, vector<32x16xf32>
    tpu.vector_store %arg12[%c0_17, %c0_18], %26 {strides = array<i32>} : memref<32x16xf32, #tpu.memory_space<vmem>>, vector<32x16xf32>,
    %28 = arith.truncf %26 : vector<32x16xf32> to vector<32x16xbf16>
    %c0_19 = arith.constant 0 : index
    %c0_20 = arith.constant 0 : index
    %29 = vector.load %arg7[%c0_19, %c0_20] : memref<16x32xbf16, #tpu.memory_space<vmem>>, vector<16x32xbf16>
    %cst_21 = arith.constant dense<0.000000e+00> : vector<32x32xf32>
    %30 = tpu.matmul %28, %29, %cst_21 {dimension_numbers = #tpu.dot_dimension_numbers<[1], [0], [0], [1], [0, 0, 1, 1], [], []>} : vector<32x16xbf16>, vector<16x32xbf16>, vector<32x32xf32> -> vector<32x32xf32>
    %c0_22 = arith.constant 0 : index
    %c0_23 = arith.constant 0 : index
    %31 = vector.load %arg8[%c0_22, %c0_23] : memref<1x32xf32, #tpu.memory_space<vmem>>, vector<1x32xf32>
    %32 = vector.broadcast %31 : vector<1x32xf32> to vector<32x32xf32>
    %33 = arith.addf %30, %32 : vector<32x32xf32>
    %cst_24 = arith.constant 0.000000e+00 : f32
    %34 = vector.broadcast %cst_24 : f32 to vector<32x32xf32>
    %35 = arith.maximumf %33, %34 : vector<32x32xf32>
    %36 = arith.truncf %35 : vector<32x32xf32> to vector<32x32xbf16>
    %c0_25 = arith.constant 0 : index
    %c0_26 = arith.constant 0 : index
    %37 = vector.load %arg9[%c0_25, %c0_26] : memref<32x64xbf16, #tpu.memory_space<vmem>>, vector<32x64xbf16>
    %cst_27 = arith.constant dense<0.000000e+00> : vector<32x64xf32>
    %38 = tpu.matmul %36, %37, %cst_27 {dimension_numbers = #tpu.dot_dimension_numbers<[1], [0], [0], [1], [0, 0, 1, 1], [], []>} : vector<32x32xbf16>, vector<32x64xbf16>, vector<32x64xf32> -> vector<32x64xf32>
    %c0_28 = arith.constant 0 : index
    %c0_29 = arith.constant 0 : index
    %39 = vector.load %arg10[%c0_28, %c0_29] : memref<1x64xf32, #tpu.memory_space<vmem>>, vector<1x64xf32>
    %40 = vector.broadcast %39 : vector<1x64xf32> to vector<32x64xf32>
    %41 = arith.addf %38, %40 : vector<32x64xf32>
    %42 = arith.negf %41 : vector<32x64xf32>
    %43 = math.exp %42 : vector<32x64xf32>
    %cst_30 = arith.constant 1.000000e+00 : f32
    %44 = vector.broadcast %cst_30 : f32 to vector<32x64xf32>
    %45 = arith.addf %44, %43 : vector<32x64xf32>
    %46 = arith.divf %44, %45 : vector<32x64xf32>
    %c0_31 = arith.constant 0 : index
    %c0_32 = arith.constant 0 : index
    %47 = vector.load %arg11[%c0_31, %c0_32] : memref<32x64xf32, #tpu.memory_space<vmem>>, vector<32x64xf32>
    tpu.vector_store %arg11[%c0_31, %c0_32], %46 {strides = array<i32>} : memref<32x64xf32, #tpu.memory_space<vmem>>, vector<32x64xf32>,
    return
  }
  func.func @transform_0(%arg0: i32) -> (i32, i32) {
    %c0_i32 = arith.constant 0 : i32
    %c0_i32_0 = arith.constant 0 : i32
    return %arg0, %c0_i32 : i32, i32
  }
  func.func @transform_1(%arg0: i32) -> (i32, i32) {
    %c0_i32 = arith.constant 0 : i32
    %c0_i32_0 = arith.constant 0 : i32
    return %arg0, %c0_i32 : i32, i32
  }
  func.func @transform_2(%arg0: i32) -> (i32, i32) {
    %c0_i32 = arith.constant 0 : i32
    %c0_i32_0 = arith.constant 0 : i32
    %c0_i32_1 = arith.constant 0 : i32
    return %c0_i32, %c0_i32_0 : i32, i32
  }
  func.func @transform_3(%arg0: i32) -> (i32, i32) {
    %c0_i32 = arith.constant 0 : i32
    %c0_i32_0 = arith.constant 0 : i32
    %c0_i32_1 = arith.constant 0 : i32
    return %c0_i32, %c0_i32_0 : i32, i32
  }
  func.func @transform_4(%arg0: i32) -> (i32, i32) {
    %c0_i32 = arith.constant 0 : i32
    %c0_i32_0 = arith.constant 0 : i32
    %c0_i32_1 = arith.constant 0 : i32
    return %c0_i32, %c0_i32_0 : i32, i32
  }
  func.func @transform_5(%arg0: i32) -> (i32, i32) {
    %c0_i32 = arith.constant 0 : i32
    %c0_i32_0 = arith.constant 0 : i32
    %c0_i32_1 = arith.constant 0 : i32
    return %c0_i32, %c0_i32_0 : i32, i32
  }
  func.func @transform_6(%arg0: i32) -> (i32, i32) {
    %c0_i32 = arith.constant 0 : i32
    %c0_i32_0 = arith.constant 0 : i32
    %c0_i32_1 = arith.constant 0 : i32
    return %c0_i32, %c0_i32_0 : i32, i32
  }
  func.func @transform_7(%arg0: i32) -> (i32, i32) {
    %c0_i32 = arith.constant 0 : i32
    %c0_i32_0 = arith.constant 0 : i32
    %c0_i32_1 = arith.constant 0 : i32
    return %c0_i32, %c0_i32_0 : i32, i32
  }
  func.func @transform_8(%arg0: i32) -> (i32, i32) {
    %c0_i32 = arith.constant 0 : i32
    %c0_i32_0 = arith.constant 0 : i32
    %c0_i32_1 = arith.constant 0 : i32
    return %c0_i32, %c0_i32_0 : i32, i32
  }
  func.func @transform_9(%arg0: i32) -> (i32, i32) {
    %c0_i32 = arith.constant 0 : i32
    %c0_i32_0 = arith.constant 0 : i32
    %c0_i32_1 = arith.constant 0 : i32
    return %c0_i32, %c0_i32_0 : i32, i32
  }
  func.func @transform_10(%arg0: i32) -> (i32, i32) {
    %c0_i32 = arith.constant 0 : i32
    %c0_i32_0 = arith.constant 0 : i32
    return %arg0, %c0_i32 : i32, i32
  }
  func.func @transform_11(%arg0: i32) -> (i32, i32) {
    %c0_i32 = arith.constant 0 : i32
    %c0_i32_0 = arith.constant 0 : i32
    return %arg0, %c0_i32 : i32, i32
  }
  func.func @transform_12(%arg0: i32) -> (i32, i32) {
    %c0_i32 = arith.constant 0 : i32
    %c0_i32_0 = arith.constant 0 : i32
    return %arg0, %c0_i32 : i32, i32
  }
}

</mosaic_0001>

<bundles_post_ra>
// kernel: tpu_custom_call.1
= control target key start
LH: loop header
LB: loop body
LE: loop exit
PB: predicated region body
PF: predicated region fallthrough
CT: control target
= control target key end

     0   :  { %vm85_vm0 = vcmask 523264   ;;  %s828_s0 = inlined_call_operand.vmem [shape: f32[32,64], index: 0, kind: input, shape index: {}]   ;;  %s829_s1 = inlined_call_operand.vmem [shape: f32[32,16], index: 1, kind: input, shape index: {}]   ;;  %s830_s2 = inlined_call_operand.vmem [shape: bf16[64,32], index: 2, kind: input, shape index: {}]   ;;  %s831_s3 = inlined_call_operand.vmem [shape: f32[1,32], index: 3, kind: input, shape index: {}]   ;;  %s832_s4 = inlined_call_operand.vmem [shape: bf16[32,16], index: 4, kind: input, shape index: {}]   ;;  %s833_s5 = inlined_call_operand.vmem [shape: f32[1,16], index: 5, kind: input, shape index: {}]   ;;  %s834_s6 = inlined_call_operand.vmem [shape: bf16[16,32], index: 6, kind: input, shape index: {}]   ;;  %s835_s7 = inlined_call_operand.vmem [shape: f32[1,32], index: 7, kind: input, shape index: {}]   ;;  %s836_s8 = inlined_call_operand.vmem [shape: bf16[32,64], index: 8, kind: input, shape index: {}]   ;;  %s837_s9 = inlined_call_operand.vmem [shape: f32[1,64], index: 9, kind: input, shape index: {}]   ;;  %s838_s10 = inlined_call_operand.hbm [shape: f32[32,64], index: 10, kind: output, shape index: {0}]   ;;  %s839_s11 = inlined_call_operand.vmem [shape: f32[32,16], index: 11, kind: output, shape index: {1}]   ;;  %s840_s12 = inlined_call_operand.vmem [shape: f32[32,16], index: 12, kind: output, shape index: {2}]  }
   0x1   :  { %v575_v0 = vld [vmem:[%s830_s2] sm:$0xff]   ;;  %v576_v1 = vld [vmem:[%s830_s2 + $0x8] sm:$0xff]   ;;  %v577_v2 = vld [vmem:[%s830_s2 + $0x10] sm:$0xff]  }
   0x2   :  { %537 = vmatprep.subr.bf16.mxu0 %v575_v0  ;;  %v40_v3 = vld [vmem:[%s828_s0] sm:$0xff]  ;;  %v41_v4 = vld [vmem:[%s828_s0 + $0x8] sm:$0xff]  ;;  %v578_v6 = vld [vmem:[%s830_s2 + $0x18] sm:$0xff]  }
   0x3   :  { %538 = vmatpush3.bf16.msra.mxu0 %v575_v0  ;;  %v44_v5 = vpack.c.bf16 %v41_v4, %v40_v3 }
   0x4   :  { %539 = vmatprep.subr.bf16.mxu0 %v576_v1 }
   0x5   :  { %545 = vmatprep.mubr.msk.bf16.mxu0 %vm85_vm0, %v44_v5 }
   0x7   :  { %540 = vmatpush3.bf16.msra.mxu0 %v576_v1 }
   0x8   :  { %541 = vmatprep.subr.bf16.mxu0 %v577_v2 }
   0x9   :  { %18 = vsyncpa [#allocation3], 0  ;;  %v42_v7 = vld [vmem:[%s828_s0 + $0x10] sm:$0xff]  ;;  %v43_v8 = vld [vmem:[%s828_s0 + $0x18] sm:$0xff]  ;;  %vm170_vm1 = vcmask 261120   ;;  %vm250_vm2 = vcmask 130048  }
   0xa   :  { %v45_v9 = vpack.c.bf16 %v43_v8, %v42_v7  ;;  %v579_v10 = vld [vmem:[%s832_s4] sm:$0xff]   ;;  %v580_v11 = vld [vmem:[%s832_s4 + $0x8] sm:$0xff]   ;;  %v257_v49 = vld [vmem:[%s829_s1 + $0x10] sm:$0xff]  ;;  %v640_v61 = vmov 0.0  }
   0xb   :  { %542 = vmatpush3.bf16.msra.mxu0 %v577_v2  ;;  %549 = vmatprep.subr.bf16.mxu1 %v579_v10  ;;  %v487_v12 = vld [vmem:[%s831_s3] ss:$0 sm:$0xff]  ;;  %v258_v52 = vld [vmem:[%s829_s1 + $0x18] sm:$0xff]  ;;  %v256_v54 = vld [vmem:[%s829_s1 + $0x8] sm:$0xff] }
   0xc   :  { %543 = vmatprep.subr.bf16.mxu0 %v578_v6  ;;  %550 = vmatpush3.bf16.msra.mxu1 %v579_v10  ;;  %v581_v27 = vld [vmem:[%s834_s6] sm:$0xff]   ;;  %v583_v5 = vld [vmem:[%s836_s8 + $0x8] sm:$0xff]  }
   0xd   :  { %551 = vmatprep.subr.bf16.mxu1 %v580_v11  ;;  %v494_v28 = vld [vmem:[%s833_s5] ss:$0 sm:$0xff] }
   0xe   :  { %v255_v50 = vld [vmem:[%s829_s1] sm:$0xff] }
   0xf   :  { %544 = vmatpush3.bf16.msra.mxu0 %v578_v6  ;;  %v582_v4 = vld [vmem:[%s836_s8] sm:$0xff]  }
  0x10   :  { %552 = vmatpush3.bf16.msra.mxu1 %v580_v11  ;;  %563 = vmatprep.subr.bf16.mxu0 %v582_v4  ;;  %v507_v6 = vld [vmem:[%s835_s7] ss:$0 sm:$0xff] }
  0x11   :  { %557 = vmatprep.subr.bf16.mxu1 %v581_v27 }
  0x12   :  { %546 = vmatmul.mubr.msk.bf16.vlgmr.msra.gmra.mrb[0].mxu0 %vm85_vm0, %v45_v9 }
  0x13   :  { %564 = vmatpush3.bf16.msra.mxu0 %v582_v4 }
  0x14   :  { %565 = vmatprep.subr.bf16.mxu0 %v583_v5 }
  0x17   :  { %566 = vmatpush3.bf16.msra.mxu0 %v583_v5 }
  0xe5   :  { %v547_v13 = vpop.f32.mrb[0].mxu0 }
  0xe6   :  { %v135_v14 = vadd.f32 %v547_v13, %v487_v12  ;;  %v126_v15 = vpop.f32.mrb[1].mxu0 }
  0xe7   :  { %v127_v16 = vadd.f32 %v487_v12, %v126_v15  ;;  %v548_v17 = vpop.f32.mrb[2].mxu0 }
  0xe8   :  { %v138_v18 = vadd.f32 %v548_v17, %v487_v12  ;;  %v129_v19 = vpop.f32.mrb[3].mxu0  ;;  %v143_v21 = vmax.f32 %v135_v14, 0.0 }
  0xe9   :  { %v130_v20 = vadd.f32 %v487_v12, %v129_v19  ;;  %v141_v23 = vmax.f32 %v127_v16, 0.0 }
  0xea   :  { %v144_v22 = vmax.f32 %v138_v18, 0.0 }
  0xeb   :  { %v142_v24 = vmax.f32 %v130_v20, 0.0 }
  0xec   :  { %v146_v25 = vpack.c.bf16 %v144_v22, %v143_v21  ;;  %v511_v21 = vld [vmem:[%s837_s9] ss:$0 sm:$0xff]  ;;  %s641_s9 = smov [#allocation2]  }
  0xed   :  { %v145_v26 = vpack.c.bf16 %v142_v24, %v141_v23 }
  0xef   :  { %553 = vmatprep.mubr.msk.bf16.mxu1 %vm170_vm1, %v145_v26 }
  0xf0   :  { %554 = vmatmul.mubr.msk.bf16.vlgmr.msra.gmra.mrb[0].mxu1 %vm170_vm1, %v146_v25 }
  0xf1   :  { %558 = vmatpush3.bf16.msra.mxu1 %v581_v27 }
 0x1c3   :  { %v555_v29 = vpop.f32.mrb[0].mxu1 }
 0x1c4   :  { %v220_v30 = vadd.f32 %v555_v29, %v494_v28  ;;  %v211_v31 = vpop.f32.mrb[1].mxu1 }
 0x1c5   :  { %v212_v32 = vadd.f32 %v494_v28, %v211_v31  ;;  %v556_v33 = vpop.f32.mrb[2].mxu1 }
 0x1c6   :  { %v501_v34 = vmul.f32 -1.442695, %v220_v30  ;;  %v223_v35 = vadd.f32 %v556_v33, %v494_v28  ;;  %v214_v36 = vpop.f32.mrb[3].mxu1 }
 0x1c7   :  { %v499_v37 = vmul.f32 -1.442695, %v212_v32  ;;  %v215_v38 = vadd.f32 %v494_v28, %v214_v36 }
 0x1c8   :  { %584 = vpow2.f32 %v501_v34  ;;  %v502_v39 = vmul.f32 -1.442695, %v223_v35 }
 0x1c9   :  { %586 = vpow2.f32 %v499_v37  ;;  %v500_v40 = vmul.f32 -1.442695, %v215_v38 }
 0x1ca   :  { %588 = vpow2.f32 %v502_v39 }
 0x1cb   :  { %590 = vpow2.f32 %v500_v40 }
 0x1d2   :  { %v585_v41 = vpop.eup %584 }
 0x1d3   :  { %v587_v42 = vpop.eup %586  ;;  %v240_v43 = vadd.f32 1.0, %v585_v41 }
 0x1d4   :  { %v589_v44 = vpop.eup %588  ;;  %v238_v45 = vadd.f32 1.0, %v587_v42 }
 0x1d5   :  { %v591_v46 = vpop.eup %590  ;;  %592 = vrcp.f32 %v240_v43  ;;  %v241_v47 = vadd.f32 1.0, %v589_v44 }
 0x1d6   :  { %594 = vrcp.f32 %v238_v45  ;;  %v239_v48 = vadd.f32 1.0, %v591_v46 }
 0x1d7   :  { %596 = vrcp.f32 %v241_v47 }
 0x1d8   :  { %598 = vrcp.f32 %v239_v48 }
 0x1df   :  { %v593_v51 = vpop.eup %592 }
 0x1e0   :  { %v595_v53 = vpop.eup %594  ;;  %253 = vst.msk [vmem:[%s840_s12 + $0x10] sm:$0xff] %vm250_vm2, %v593_v51  ;;  %v261_v55 = vadd.f32 %v593_v51, %v257_v49 }
 0x1e1   :  { %v597_v56 = vpop.eup %596  ;;  %251 = vst.msk [vmem:[%s840_s12] sm:$0xff] %vm250_vm2, %v595_v53  ;;  %v259_v57 = vadd.f32 %v595_v53, %v255_v50 }
 0x1e2   :  { %v599_v58 = vpop.eup %598  ;;  %254 = vst.msk [vmem:[%s840_s12 + $0x18] sm:$0xff] %vm250_vm2, %v597_v56  ;;  %v262_v59 = vadd.f32 %v597_v56, %v258_v52  ;;  %vm265_vm3 = vcmp.gt.f32.partialorder %v261_v55, 1.0 }
 0x1e3   :  { %252 = vst.msk [vmem:[%s840_s12 + $0x8] sm:$0xff] %vm250_vm2, %v599_v58  ;;  %v260_v60 = vadd.f32 %v599_v58, %v256_v54  ;;  %vm263_vm4 = vcmp.gt.f32.partialorder %v259_v57, 1.0  ;;  %v505_v62 = vsel %vm265_vm3, 1.0, %v640_v61 }
 0x1e4   :  { %v503_v63 = vsel %vm263_vm4, 1.0, %v640_v61  ;;  %vm266_vm5 = vcmp.gt.f32.partialorder %v262_v59, 1.0  ;;  %277 = vst.msk [vmem:[%s839_s11 + $0x10] sm:$0xff] %vm250_vm2, %v505_v62 }
 0x1e5   :  { %vm264_vm6 = vcmp.gt.f32.partialorder %v260_v60, 1.0  ;;  %275 = vst.msk [vmem:[%s839_s11] sm:$0xff] %vm250_vm2, %v503_v63  ;;  %v506_v0 = vsel %vm266_vm5, 1.0, %v640_v61 }
 0x1e6   :  { %v504_v1 = vsel %vm264_vm6, 1.0, %v640_v61  ;;  %278 = vst.msk [vmem:[%s839_s11 + $0x18] sm:$0xff] %vm250_vm2, %v506_v0  ;;  %v280_v2 = vpack.c.bf16 %v506_v0, %v505_v62 }
 0x1e7   :  { %276 = vst.msk [vmem:[%s839_s11 + $0x8] sm:$0xff] %vm250_vm2, %v504_v1  ;;  %v279_v3 = vpack.c.bf16 %v504_v1, %v503_v63  ;;  %s468_s11 = sshll.u32 %s641_s9, 4  ;;  %s469_s11 = int_to_ptr.vmem [resolvable:$true] %s468_s11 }
 0x1e8   :  { %s616_s27 = scalar_lea.vmem %s469_s11, 512  ;;  %p621_p1 = scmp.lt.s32.totalorder %s469_s11, %s469_s11 }
 0x1e9   :  { %559 = vmatprep.mubr.msk.bf16.mxu1 %vm250_vm2, %v279_v3  ;;  %p617_p0 = scmp.ne.s32.totalorder %s469_s11, %s616_s27  ;;  %p622_p2 = scmp.lt.s32.totalorder %s616_s27, %s616_s27 }
 0x1ea   :  { %560 = vmatmul.mubr.msk.bf16.vlgmr.msra.gmra.mrb[4].mxu1 %vm250_vm2, %v280_v2 }
 0x1eb   :  { %p623_p3 = por %p622_p2, %p621_p1 }
 0x1ed   :  { %p624_p4 = pnand %p623_p3, %p617_p0 }
 0x2bd   :  { %v561_v7 = vpop.f32.mrb[4].mxu1 }
 0x2be   :  { %v345_v8 = vadd.f32 %v561_v7, %v507_v6  ;;  %v336_v9 = vpop.f32.mrb[5].mxu1 }
 0x2bf   :  { %v337_v10 = vadd.f32 %v507_v6, %v336_v9  ;;  %v562_v11 = vpop.f32.mrb[6].mxu1 }
 0x2c0   :  { %v348_v12 = vadd.f32 %v562_v11, %v507_v6  ;;  %v339_v13 = vpop.f32.mrb[7].mxu1  ;;  %v353_v15 = vmax.f32 %v345_v8, 0.0 }
 0x2c1   :  { %v340_v14 = vadd.f32 %v507_v6, %v339_v13  ;;  %v351_v17 = vmax.f32 %v337_v10, 0.0 }
 0x2c2   :  { %v354_v16 = vmax.f32 %v348_v12, 0.0 }
 0x2c3   :  { %v352_v18 = vmax.f32 %v340_v14, 0.0 }
 0x2c4   :  { %v356_v19 = vpack.c.bf16 %v354_v16, %v353_v15 }
 0x2c5   :  { %v355_v20 = vpack.c.bf16 %v352_v18, %v351_v17 }
 0x2c7   :  { %567 = vmatprep.mubr.msk.bf16.mxu0 %vm170_vm1, %v355_v20 }
 0x2c8   :  { %568 = vmatmul.mubr.msk.bf16.vlgmr.msra.gmra.mrb[4].mxu0 %vm170_vm1, %v356_v19 }
 0x39b   :  { %v569_v22 = vpop.f32.mrb[4].mxu0 }
 0x39c   :  { %v429_v23 = vadd.f32 %v569_v22, %v511_v21  ;;  %v420_v24 = vpop.f32.mrb[5].mxu0 }
 0x39d   :  { %v421_v25 = vadd.f32 %v511_v21, %v420_v24  ;;  %v570_v26 = vpop.f32.mrb[6].mxu0 }
 0x39e   :  { %v518_v27 = vmul.f32 -1.442695, %v429_v23  ;;  %v432_v28 = vadd.f32 %v570_v26, %v511_v21  ;;  %v423_v29 = vpop.f32.mrb[7].mxu0 }
 0x39f   :  { %v516_v30 = vmul.f32 -1.442695, %v421_v25  ;;  %v424_v31 = vadd.f32 %v511_v21, %v423_v29 }
 0x3a0   :  { %600 = vpow2.f32 %v518_v27  ;;  %v519_v32 = vmul.f32 -1.442695, %v432_v28 }
 0x3a1   :  { %602 = vpow2.f32 %v516_v30  ;;  %v517_v33 = vmul.f32 -1.442695, %v424_v31 }
 0x3a2   :  { %604 = vpow2.f32 %v519_v32 }
 0x3a3   :  { %606 = vpow2.f32 %v517_v33 }
 0x3aa   :  { %v601_v34 = vpop.eup %600 }
 0x3ab   :  { %v603_v35 = vpop.eup %602  ;;  %v449_v36 = vadd.f32 1.0, %v601_v34 }
 0x3ac   :  { %v605_v37 = vpop.eup %604  ;;  %v447_v38 = vadd.f32 1.0, %v603_v35 }
 0x3ad   :  { %v607_v39 = vpop.eup %606  ;;  %608 = vrcp.f32 %v449_v36  ;;  %v450_v40 = vadd.f32 1.0, %v605_v37 }
 0x3ae   :  { %610 = vrcp.f32 %v447_v38  ;;  %v448_v41 = vadd.f32 1.0, %v607_v39 }
 0x3af   :  { %612 = vrcp.f32 %v450_v40 }
 0x3b0   :  { %614 = vrcp.f32 %v448_v41 }
 0x3b7   :  { %v609_v42 = vpop.eup %608 }
 0x3b8   :  { %v611_v43 = vpop.eup %610  ;;  %461 = vst.msk [vmem:[#allocation2 + $0x10] sm:$0xff] %vm85_vm0, %v609_v42 }
 0x3b9   :  { %v613_v44 = vpop.eup %612  ;;  %459 = vst.msk [vmem:[#allocation2] sm:$0xff] %vm85_vm0, %v611_v43 }
 0x3ba   :  { %v615_v45 = vpop.eup %614  ;;  %462 = vst.msk [vmem:[#allocation2 + $0x18] sm:$0xff] %vm85_vm0, %v613_v44 }
 0x3bb   :  { %460 = vst.msk [vmem:[#allocation2 + $0x8] sm:$0xff] %vm85_vm0, %v615_v45 }
 0x3bc   :  { %627 = shalt.err (!%p624_p4)
}
 0x3bd   :  { %s628_s30 = scalar_lea.hbm %s838_s10, 512 }
 0x3be   :  { %p629_p5 = scmp.ne.s32.totalorder %s838_s10, %s628_s30  ;;  %p632_p6 = scmp.lt.u32.totalorder %s628_s30, %s838_s10 }
 0x3c0   :  { %p634_p7 = pnand %p632_p6, %p629_p5 }
 0x3c2   :  { %637 = shalt.err (!%p634_p7)
}
 0x3c3   :  { %s642_s17 = smov 128   ;;  %s643_s18 = smov 8  }
 0x3c4   :  { %474 = dma.vmem_to_hbm [thread:$0]  %s469_s11, 512, %s838_s10, [#allocation3], %s642_s17, %s642_s17, %s643_s18  }
 0x3c5   :  { %638 = dma.done.wait [#allocation3], 512  }
 0x3c6   :  { %639 = vsyncadd [#allocation3], 4294966784 }
 0x3c7   :  { %486 = vsyncpa [#allocation3], 1 }

</bundles_post_ra>
